<compile_context>
chip_gen: v5e
topology: v5e:2x2
jax: 0.10.0
libtpu: 0.0.40
codegen_flags: <defaults>
</compile_context>

<pallas_src>
import jax
import jax.numpy as jnp
from jax.experimental import pallas as pl
from jax.experimental.pallas import tpu as pltpu


def _round_up(n: int, m: int) -> int:
    return ((n + m - 1) // m) * m


def _ffn_kernel(x_ref, w1_ref, b1_ref, w2_ref, b2_ref, o_ref, acc_ref):
    # x_ref : (tm, d_in)    row tile (native dtype -> MXU)
    # w1_ref: (d_in, tk)    K-slice of linear1 weight, (in, out) layout
    # b1_ref: (1, tk)       K-slice of linear1 bias
    # w2_ref: (tk, d_out)   K-slice of linear2 weight, (in, out) layout
    # b2_ref: (1, d_out)    linear2 bias (resident)
    # acc_ref: (tm, d_out)  f32 accumulator, lives across the K axis
    k = pl.program_id(1)

    @pl.when(k == 0)
    def _init():
        acc_ref[...] = jnp.zeros_like(acc_ref)

    # hidden K-slice: relu(x @ W1[:, k_slice] + b1[k_slice]); f32 accumulate on MXU,
    # f32 epilogue on the VPU.  Zero-padded hidden columns stay exactly 0.
    h = jnp.dot(x_ref[...], w1_ref[...], preferred_element_type=jnp.float32)
    h = jnp.maximum(h + b1_ref[...].astype(jnp.float32), 0.0)
    # TODO(synk): training-mode dropout would need pltpu.prng_seed / prng_random_bits here;
    # with dropout_rate=0 / eval mode it is the identity.

    acc_ref[...] += jnp.dot(h.astype(w2_ref.dtype), w2_ref[...],
                            preferred_element_type=jnp.float32)

    @pl.when(k == pl.num_programs(1) - 1)
    def _finalize():
        o_ref[...] = (acc_ref[...] + b2_ref[...].astype(jnp.float32)).astype(o_ref.dtype)


def prepare_ffn_params(w1, b1, w2, b2, *, max_block_k: int = 512):
    """One-time parameter preparation (call at load time, NOT per forward).

    w1: (H, D_in), b1: (H,)      -- nn.Linear(input_size, hidden_size)
    w2: (D_out, H), b2: (D_out,) -- nn.Linear(hidden_size, output_size)

    Transposes to (in, out) layout and zero-pads the hidden dim to a multiple of
    the K tile (padding is exact: relu(x @ 0 + 0) = 0 contributes nothing).
    """
    h_dim, d_in = w1.shape
    d_out, h_dim2 = w2.shape
    assert h_dim == h_dim2 and b1.shape == (h_dim,) and b2.shape == (d_out,)

    tk = h_dim if h_dim <= max_block_k else max_block_k  # full dim, or 128-multiple tile
    h_pad = _round_up(h_dim, tk)

    w1t = jnp.transpose(w1)            # (D_in, H)
    w2t = jnp.transpose(w2)            # (H, D_out)
    b1r = b1.reshape(1, h_dim)
    b2r = b2.reshape(1, d_out)
    if h_pad != h_dim:
        w1t = jnp.pad(w1t, ((0, 0), (0, h_pad - h_dim)))
        w2t = jnp.pad(w2t, ((0, h_pad - h_dim), (0, 0)))
        b1r = jnp.pad(b1r, ((0, 0), (0, h_pad - h_dim)))

    return {"w1t": w1t, "b1": b1r, "w2t": w2t, "b2": b2r, "block_k": tk}


def feed_forward_network(x, params, *, block_rows: int = 512, dropout_rate: float = 0.0):
    """Pallas FFN forward: linear1 -> relu -> dropout(identity at p=0) -> linear2.

    x: (..., D_in); params from prepare_ffn_params.  Returns (..., D_out).
    """
    if dropout_rate != 0.0:
        # TODO(synk): training-mode dropout not implemented (inference / p=0 only).
        raise NotImplementedError("dropout_rate != 0 (training) is not implemented")

    w1t, b1r, w2t, b2r = params["w1t"], params["b1"], params["w2t"], params["b2"]
    tk = params["block_k"]
    d_in, h_pad = w1t.shape
    h_pad2, d_out = w2t.shape
    assert h_pad == h_pad2 and h_pad % tk == 0

    *lead, d_in_x = x.shape
    assert d_in_x == d_in
    x2 = x.reshape(-1, d_in)
    n = x2.shape[0]

    # Row tile: sublane-aligned for the dtype (8 f32 / 16 bf16 / 32 int8),
    # capped at block_rows, and split so the "parallel" row axis has >= 2 grid
    # steps (keeps both v7x TensorCores busy at small batch).
    sub = max(8, 32 // jnp.dtype(x.dtype).itemsize)
    tm = min(block_rows, _round_up(n, sub))
    if n > sub and pl.cdiv(n, tm) < 2:
        tm = _round_up(pl.cdiv(n, 2), sub)

    grid = (pl.cdiv(n, tm), h_pad // tk)

    # Explicit VMEM budget: double-buffered x/out/weight-slice/bias blocks + f32 acc,
    # with headroom; floored at 32 MiB, capped at v7x's 64 MiB physical.
    ix = jnp.dtype(x.dtype).itemsize
    iw = jnp.dtype(w1t.dtype).itemsize
    buf = 2 * (tm * d_in * ix + tm * d_out * ix
               + d_in * tk * iw + tk * d_out * iw + tk * iw + d_out * iw)
    buf += tm * d_out * 4
    vmem_limit = int(min(max(2 * buf, 32 * 1024 * 1024), 64 * 1024 * 1024))

    flops = 2 * n * d_in * h_pad + 2 * n * h_pad * d_out
    bytes_accessed = int(n * d_in * ix + n * d_out * ix
                         + (w1t.size + w2t.size + b1r.size + b2r.size) * iw)
    cost = pl.CostEstimate(flops=flops, transcendentals=0, bytes_accessed=bytes_accessed)

    out = pl.pallas_call(
        _ffn_kernel,
        out_shape=jax.ShapeDtypeStruct((n, d_out), x.dtype),
        grid=grid,
        in_specs=[
            pl.BlockSpec((tm, d_in), lambda i, k: (i, 0)),    # x row tile
            pl.BlockSpec((d_in, tk), lambda i, k: (0, k)),    # W1 (in,out) K-slice
            pl.BlockSpec((1, tk), lambda i, k: (0, k)),       # b1 K-slice
            pl.BlockSpec((tk, d_out), lambda i, k: (k, 0)),   # W2 (in,out) K-slice
            pl.BlockSpec((1, d_out), lambda i, k: (0, 0)),    # b2 (resident)
        ],
        out_specs=pl.BlockSpec((tm, d_out), lambda i, k: (i, 0)),
        scratch_shapes=[pltpu.VMEM((tm, d_out), jnp.float32)],
        compiler_params=pltpu.CompilerParams(
            dimension_semantics=("parallel", "arbitrary"),
            vmem_limit_bytes=vmem_limit),
        cost_estimate=cost,
    )(x2, w1t, b1r, w2t, b2r)

    return out.reshape(*lead, d_out)


def _reference(x, w1, b1, w2, b2):
    h = jax.nn.relu(jnp.einsum("...d,hd->...h", x, w1) + b1)
    return jnp.einsum("...h,oh->...o", h, w2) + b2


if __name__ == "__main__":
    key = jax.random.PRNGKey(0)
    B, L = 2, 8
    input_size, hidden_size, output_size = 32, 64, 32

    kx, kw1, kb1, kw2, kb2 = jax.random.split(key, 5)
    x = jax.random.normal(kx, (B, L, input_size), dtype=jnp.float32)

    # Deterministic nn.Linear-like init: uniform(-1/sqrt(fan_in), 1/sqrt(fan_in)).
    bnd1 = 1.0 / jnp.sqrt(jnp.float32(input_size))
    w1 = jax.random.uniform(kw1, (hidden_size, input_size),
                            minval=-bnd1, maxval=bnd1, dtype=jnp.float32)
    b1 = jax.random.uniform(kb1, (hidden_size,),
                            minval=-bnd1, maxval=bnd1, dtype=jnp.float32)
    bnd2 = 1.0 / jnp.sqrt(jnp.float32(hidden_size))
    w2 = jax.random.uniform(kw2, (output_size, hidden_size),
                            minval=-bnd2, maxval=bnd2, dtype=jnp.float32)
    b2 = jax.random.uniform(kb2, (output_size,),
                            minval=-bnd2, maxval=bnd2, dtype=jnp.float32)

    params = prepare_ffn_params(w1, b1, w2, b2)        # one-time prep (load time)
    out = feed_forward_network(x, params)
    out = jax.block_until_ready(out)

    ref = _reference(x, w1, b1, w2, b2)
    assert out.shape == (B, L, output_size)
    assert jnp.allclose(out, ref, atol=1e-4, rtol=1e-4), "mismatch vs reference"

    print("KERNEL_OK")
</pallas_src>

<mosaic_0001>
module attributes {stable_mosaic.version = 11 : i64} {
  func.func @_ffn_kernel(%arg0: i32, %arg1: i32, %arg2: memref<8x32xf32, #tpu.memory_space<vmem>>, %arg3: memref<32x64xf32, #tpu.memory_space<vmem>>, %arg4: memref<1x64xf32, #tpu.memory_space<vmem>>, %arg5: memref<64x32xf32, #tpu.memory_space<vmem>>, %arg6: memref<1x32xf32, #tpu.memory_space<vmem>>, %arg7: memref<8x32xf32, #tpu.memory_space<vmem>>, %arg8: memref<8x32xf32, #tpu.memory_space<vmem>>) attributes {dimension_semantics = [#tpu.dimension_semantics<parallel>, #tpu.dimension_semantics<arbitrary>], iteration_bounds = array<i64: 2, 1>, scalar_prefetch = 0 : i64, scratch_operands = 1 : i64, tpu.core_type = #tpu.core_type<tc>, window_params = [{transform_indices = @transform_0, window_bounds = array<i64: 8, 32>}, {transform_indices = @transform_1, window_bounds = array<i64: 32, 64>}, {transform_indices = @transform_2, window_bounds = array<i64: 1, 64>}, {transform_indices = @transform_3, window_bounds = array<i64: 64, 32>}, {pipeline_mode = #tpu.pipeline_mode<synchronous>, transform_indices = @transform_4, window_bounds = array<i64: 1, 32>}, {transform_indices = @transform_5, window_bounds = array<i64: 8, 32>}]} {
    %c0_i32 = arith.constant 0 : i32
    %0 = arith.cmpi eq, %arg1, %c0_i32 : i32
    %1 = arith.extui %0 : i1 to i32
    %c0_i32_0 = arith.constant 0 : i32
    %2 = arith.cmpi ne, %1, %c0_i32_0 : i32
    scf.if %2 {
      %cst_16 = arith.constant 0.000000e+00 : f32
      %19 = vector.broadcast %cst_16 : f32 to vector<8x32xf32>
      %c0_17 = arith.constant 0 : index
      %c0_18 = arith.constant 0 : index
      %20 = vector.load %arg8[%c0_17, %c0_18] : memref<8x32xf32, #tpu.memory_space<vmem>>, vector<8x32xf32>
      tpu.vector_store %arg8[%c0_17, %c0_18], %19 {strides = array<i32>} : memref<8x32xf32, #tpu.memory_space<vmem>>, vector<8x32xf32>,
    } else {
    }
    %c0 = arith.constant 0 : index
    %c0_1 = arith.constant 0 : index
    %3 = vector.load %arg2[%c0, %c0_1] : memref<8x32xf32, #tpu.memory_space<vmem>>, vector<8x32xf32>
    %c0_2 = arith.constant 0 : index
    %c0_3 = arith.constant 0 : index
    %4 = vector.load %arg3[%c0_2, %c0_3] : memref<32x64xf32, #tpu.memory_space<vmem>>, vector<32x64xf32>
    %cst = arith.constant dense<0.000000e+00> : vector<8x64xf32>
    %5 = tpu.matmul %3, %4, %cst {dimension_numbers = #tpu.dot_dimension_numbers<[1], [0], [0], [1], [0, 0, 1, 1], [], []>} : vector<8x32xf32>, vector<32x64xf32>, vector<8x64xf32> -> vector<8x64xf32>
    %c0_4 = arith.constant 0 : index
    %c0_5 = arith.constant 0 : index
    %6 = vector.load %arg4[%c0_4, %c0_5] : memref<1x64xf32, #tpu.memory_space<vmem>>, vector<1x64xf32>
    %7 = vector.broadcast %6 : vector<1x64xf32> to vector<8x64xf32>
    %8 = arith.addf %5, %7 : vector<8x64xf32>
    %cst_6 = arith.constant 0.000000e+00 : f32
    %9 = vector.broadcast %cst_6 : f32 to vector<8x64xf32>
    %10 = arith.maximumf %8, %9 : vector<8x64xf32>
    %c0_7 = arith.constant 0 : index
    %c0_8 = arith.constant 0 : index
    %11 = vector.load %arg8[%c0_7, %c0_8] : memref<8x32xf32, #tpu.memory_space<vmem>>, vector<8x32xf32>
    %c0_9 = arith.constant 0 : index
    %c0_10 = arith.constant 0 : index
    %12 = vector.load %arg5[%c0_9, %c0_10] : memref<64x32xf32, #tpu.memory_space<vmem>>, vector<64x32xf32>
    %cst_11 = arith.constant dense<0.000000e+00> : vector<8x32xf32>
    %13 = tpu.matmul %10, %12, %cst_11 {dimension_numbers = #tpu.dot_dimension_numbers<[1], [0], [0], [1], [0, 0, 1, 1], [], []>} : vector<8x64xf32>, vector<64x32xf32>, vector<8x32xf32> -> vector<8x32xf32>
    %14 = arith.addf %11, %13 : vector<8x32xf32>
    %c0_12 = arith.constant 0 : index
    %c0_13 = arith.constant 0 : index
    %15 = vector.load %arg8[%c0_12, %c0_13] : memref<8x32xf32, #tpu.memory_space<vmem>>, vector<8x32xf32>
    tpu.vector_store %arg8[%c0_12, %c0_13], %14 {strides = array<i32>} : memref<8x32xf32, #tpu.memory_space<vmem>>, vector<8x32xf32>,
    %c0_i32_14 = arith.constant 0 : i32
    %16 = arith.cmpi eq, %arg1, %c0_i32_14 : i32
    %17 = arith.extui %16 : i1 to i32
    %c0_i32_15 = arith.constant 0 : i32
    %18 = arith.cmpi ne, %17, %c0_i32_15 : i32
    scf.if %18 {
      %c0_16 = arith.constant 0 : index
      %c0_17 = arith.constant 0 : index
      %19 = vector.load %arg8[%c0_16, %c0_17] : memref<8x32xf32, #tpu.memory_space<vmem>>, vector<8x32xf32>
      %c0_18 = arith.constant 0 : index
      %c0_19 = arith.constant 0 : index
      %20 = vector.load %arg6[%c0_18, %c0_19] : memref<1x32xf32, #tpu.memory_space<vmem>>, vector<1x32xf32>
      %21 = vector.broadcast %20 : vector<1x32xf32> to vector<8x32xf32>
      %22 = arith.addf %19, %21 : vector<8x32xf32>
      %c0_20 = arith.constant 0 : index
      %c0_21 = arith.constant 0 : index
      %23 = vector.load %arg7[%c0_20, %c0_21] : memref<8x32xf32, #tpu.memory_space<vmem>>, vector<8x32xf32>
      tpu.vector_store %arg7[%c0_20, %c0_21], %22 {strides = array<i32>} : memref<8x32xf32, #tpu.memory_space<vmem>>, vector<8x32xf32>,
    } else {
    }
    return
  }
  func.func @transform_0(%arg0: i32, %arg1: i32) -> (i32, i32) {
    %c0_i32 = arith.constant 0 : i32
    %c0_i32_0 = arith.constant 0 : i32
    return %arg0, %c0_i32 : i32, i32
  }
  func.func @transform_1(%arg0: i32, %arg1: i32) -> (i32, i32) {
    %c0_i32 = arith.constant 0 : i32
    %c0_i32_0 = arith.constant 0 : i32
    return %c0_i32, %arg1 : i32, i32
  }
  func.func @transform_2(%arg0: i32, %arg1: i32) -> (i32, i32) {
    %c0_i32 = arith.constant 0 : i32
    %c0_i32_0 = arith.constant 0 : i32
    return %c0_i32, %arg1 : i32, i32
  }
  func.func @transform_3(%arg0: i32, %arg1: i32) -> (i32, i32) {
    %c0_i32 = arith.constant 0 : i32
    %c0_i32_0 = arith.constant 0 : i32
    return %arg1, %c0_i32 : i32, i32
  }
  func.func @transform_4(%arg0: i32, %arg1: i32) -> (i32, i32) {
    %c0_i32 = arith.constant 0 : i32
    %c0_i32_0 = arith.constant 0 : i32
    %c0_i32_1 = arith.constant 0 : i32
    return %c0_i32, %c0_i32_0 : i32, i32
  }
  func.func @transform_5(%arg0: i32, %arg1: i32) -> (i32, i32) {
    %c0_i32 = arith.constant 0 : i32
    %c0_i32_0 = arith.constant 0 : i32
    return %arg0, %c0_i32 : i32, i32
  }
}

</mosaic_0001>

<bundles_post_ra>
// kernel: tpu_custom_call.1
= control target key start
LH: loop header
LB: loop body
LE: loop exit
PB: predicated region body
PF: predicated region fallthrough
CT: control target
= control target key end

     0   :  { %10 = vsyncpa [#allocation4], 0  ;;  %s823_s0 = inlined_call_operand.vmem [shape: f32[16,32], index: 0, kind: input, shape index: {}]   ;;  %s824_s1 = inlined_call_operand.vmem [shape: f32[32,64], index: 1, kind: input, shape index: {}]   ;;  %s825_s2 = inlined_call_operand.vmem [shape: f32[1,64], index: 2, kind: input, shape index: {}]   ;;  %s826_s3 = inlined_call_operand.vmem [shape: f32[64,32], index: 3, kind: input, shape index: {}]   ;;  %s827_s4 = inlined_call_operand.vmem [shape: f32[1,32], index: 4, kind: input, shape index: {}]   ;;  %s828_s5 = inlined_call_operand.hbm [shape: f32[16,32], index: 5, kind: output, shape index: {}]  }
   0x1   :  { %12 = vsyncpa [#allocation4 + $0x1], 0  ;;  %s680_s18 = smov 0   ;;  %s682_s19 = smov 0  }
   0x2   :  { %s684_s20 = smov 0   ;;  %s686_s21 = smov 0  }
   0x3   :  { %s688_s22 = smov 0   ;;  %s690_s23 = smov 0  }
   0x4 LB: > { %s495_s24 = sadd.s32 4294967295, %s647_s23   ;;  %s496_s25 = sadd.s32 4294967294, %s647_s23   ;;  %s647_s23 = sphi %s690_s23, %s18_s23   ;;  %s643_s22 = sphi %s688_s22, %s835_s22   ;;  %s639_s21 = sphi %s686_s21, %s834_s21   ;;  %s635_s20 = sphi %s684_s20, %s833_s20   ;;  %s631_s19 = sphi %s682_s19, %s832_s19   ;;  %s627_s18 = sphi %s680_s18, %s831_s18  }
   0x5   : > { %s30_s26 = sadd.s32 1, %s643_s22  ;;  %s162_s27 = sadd.s32 1, %s635_s20 }
   0x6   : > { %p32_p0 = scmp.ge.s32.totalorder %s30_s26, 2  ;;  %p172_p1 = scmp.ne.s32.totalorder %s635_s20, %s631_s19 }
   0x7   : > { %p173_p2 = scmp.eq.s32.totalorder %s495_s24, 1  ;;  %p178_p3 = scmp.ne.s32.totalorder %s631_s19, %s627_s18 }
   0x8   : > { %s837_s26 = smov (%p32_p0, %s30_s26), 0  ;;  %p179_p5 = scmp.eq.s32.totalorder %s496_s25, 1 }
   0x9   : > { %p720_p4 = por %p173_p2, %p172_p1  ;;  %s159_s29 = ssub.s32 %s643_s22, %s837_s26 }
   0xa   : > { %p502_p6 = scmp.ge.s32.totalorder %s647_s23, 1  ;;  %p160_p7 = scmp.eq.s32.totalorder %s159_s29, 0 }
   0xb   : > { %p727_p8 = por %p179_p5, %p178_p3  ;;  %p229_p9 = scmp.lt.s32.totalorder %s647_s23, 3 }
   0xc   : > { %s733_s6 = scalar_select %p160_p7, %s635_s20, %s162_s27  }
   0xd   : > { %p230_p10 = pnand %p502_p6, %p229_p9 }
   0xe   : > { %p268_p11 = scmp.lt.s32.totalorder (!%p230_p10), %s639_s21, 1  ;;  %s265_s8 = sand.u32 (!%p230_p10), 1, %s631_s19  }
   0xf   : > { %233 = sbr.rel (%p230_p10) target bundleno = 299 (0x12b), region = 40  ;;  %s503_s9 = sshll.u32 (!%p230_p10), %s265_s8, 3 }
  0x10   : > { %s267_s16 = scalar_lea.vmem (!%p230_p10), [#allocation3], %s503_s9  ;;  %s589_s9 = scalar_lea.hbm (!%p230_p10), %s828_s5, 16 }
  0x14   : > { %v295_v0 = vld [vmem:[%s824_s1 + $0x18] sm:$0xff]  ;;  %v294_v1 = vld [vmem:[%s824_s1 + $0x10] sm:$0xff]  ;;  %vm289_vm0 = vcmask 261120   ;;  %v649_v2 = vmov 0.0   ;;  %v293_v5 = vld [vmem:[%s824_s1 + $0x8] sm:$0xff]  ;;  %s269_s17 = scalar_select %p268_p11, %s639_s21, 1 }
  0x15   : > { %316 = vmatpush.msra.mxu0 %v295_v0  ;;  %290 = vst.msk [vmem:[#allocation2] sm:$0xff] %vm289_vm0, %v649_v2  ;;  %v333_v3 = vld [vmem:[%s826_s3 + $0x38] sm:$0xff]  ;;  %v332_v4 = vld [vmem:[%s826_s3 + $0x30] sm:$0xff]  ;;  %v331_v6 = vld [vmem:[%s826_s3 + $0x28] sm:$0xff]  ;;  %vm334_vm1 = vcmask 523264  }
  0x16   : > { %346 = vmatpush.msra.mxu1 %v333_v3  ;;  %v292_v7 = vld [vmem:[%s824_s1] sm:$0xff]  ;;  %s504_s7 = sshll.u32 %s269_s17, 3  ;;  %v329_v10 = vld [vmem:[%s826_s3 + $0x18] sm:$0xff]  ;;  %v328_v11 = vld [vmem:[%s826_s3 + $0x10] sm:$0xff]  ;;  %s383_s17 = sshll.u32 %s267_s16, 4  ;;  %s384_s17 = int_to_ptr.vmem [resolvable:$true] %s383_s17 }
  0x17   : > { %317 = vmatpush.msra.mxu0 %v294_v1  ;;  %s271_s10 = scalar_lea.vmem %s823_s0, %s504_s7  ;;  %v330_v8 = vld [vmem:[%s826_s3 + $0x20] sm:$0xff]  ;;  %v327_v12 = vld [vmem:[%s826_s3 + $0x8] sm:$0xff] }
  0x18   : > { %347 = vmatpush.msra.mxu1 %v332_v4  ;;  %v291_v9 = vld [vmem:[%s271_s10] sm:$0xff]  ;;  %s508_s10 = sshll.u32 %s639_s21, 3  ;;  %s371_s21 = scalar_lea.sflag [#allocation4], %s265_s8 }
  0x19   : > { %318 = vmatpush.msra.mxu0 %v293_v5  ;;  %v326_v13 = vld [vmem:[%s826_s3] sm:$0xff]  ;;  %s381_s13 = scalar_lea.hbm %s828_s5, %s508_s10 }
  0x1a   : > { %348 = vmatpush.msra.mxu1 %v331_v6  ;;  %v567_v14 = vld [vmem:[%s825_s2] ss:$0 sm:$0xff]  ;;  %s385_s24 = sshll.u32 %s381_s13, 4  ;;  %s386_s24 = int_to_ptr.hbm [resolvable:$true] %s385_s24 }
  0x1b   : > { %319 = vmatpush.msra.mxu0 %v292_v7  ;;  %v568_v21 = vld [vmem:[%s827_s4] ss:$0 sm:$0xff]  ;;  %s583_s25 = sshra.s32 %s386_s24, 4  ;;  %s584_s25 = int_to_ptr.hbm [resolvable:$true] %s583_s25 }
  0x1c   : > { %505 = vmatmul.msk.f32.vlgmr.msra.gmra.mxu0 %vm289_vm0, %v291_v9  ;;  %349 = vmatpush.msra.mxu1 %v330_v8  ;;  %v325_v18 = vld [vmem:[#allocation2] sm:$0xff]  ;;  %s585_s27 = scalar_lea.hbm %s584_s25, 8  ;;  %p590_p1 = scmp.lt.s32.totalorder %s584_s25, %s828_s5 }
  0x1d   : > { %p586_p12 = scmp.ne.s32.totalorder %s584_s25, %s585_s27  ;;  %p591_p2 = scmp.lt.s32.totalorder %s589_s9, %s585_s27 }
  0x1e   : > { %350 = vmatpush.msra.mxu1 %v329_v10 }
  0x1f   : > { %p587_p13 = pnand %p586_p12, %p720_p4  ;;  %p592_p3 = por %p591_p2, %p590_p1 }
  0x20   : > { %351 = vmatpush.msra.mxu1 %v328_v11 }
  0x21   : > { %p588_p0 = pneg %p587_p13 }
  0x22   : > { %352 = vmatpush.msra.mxu1 %v327_v12 }
  0x23   : > { %p593_p5 = pnand %p592_p3, %p588_p0 }
  0x24   : > { %353 = vmatpush.msra.mxu1 %v326_v13 }
  0x99   : > { %v321_v15 = vpop.f32.mrf.mxu0 }
  0x9a   : > { %v322_v16 = vadd.f32 %v567_v14, %v321_v15 }
  0x9c   : > { %v324_v17 = vmax.f32 %v322_v16, 0.0 }
  0x9e   : > { %506 = vmatmul.msk.f32.vlgmr.msra.gmra.mxu1 %vm334_vm1, %v324_v17 }
 0x11b   : > { %v355_v19 = vpop.f32.mrf.mxu1 }
 0x11c   : > { %v358_v20 = vadd.f32 %v355_v19, %v325_v18 }
 0x11e   : > { %359 = vst.msk [vmem:[#allocation2] sm:$0xff] %vm289_vm0, %v358_v20 }
 0x125   : > { %v363_v22 = vld [vmem:[#allocation2] sm:$0xff] }
 0x126   : > { %v368_v23 = vadd.f32 %v568_v21, %v363_v22 }
 0x128   : > { %369 = vst.msk [vmem:[%s267_s16] sm:$0xff] %vm289_vm0, %v368_v23 }
 0x129   : > { %596 = shalt.err (!%p593_p5)
}
 0x12a   : > { %511 = dma.vmem_to_hbm [thread:$0]  (%p720_p4), %s384_s17, 128, %s386_s24, %s371_s21  }
 0x12b PF: > { %p517_p6 = scmp.ge.s32.totalorder %s647_s23, 2  ;;  %s397_s8 = sand.u32 1, %s627_s18  }
 0x12c   : > { %s398_s12 = scalar_lea.sflag [#allocation4], %s397_s8 }
 0x12d   : > { %p514_p7 = pnand %p517_p6, %p727_p8 }
 0x12f   : > { %p515_p9 = pneg %p514_p7 }
 0x131   : > { %622 = dma.done.wait (%p515_p9), %s398_s12, 128  }
 0x132   : > { %624 = vsyncadd (%p515_p9), %s398_s12, 4294967168  ;;  %s18_s23 = sadd.s32 1, %s647_s23   ;;  %s831_s18 = smov %s631_s19 }
 0x133   : > { %p15_p10 = scmp.ge.s32.totalorder %s18_s23, 4   ;;  %s832_s19 = smov %s635_s20 }
 0x134   : > { %s833_s20 = smov %s733_s6  ;;  %s834_s21 = smov %s643_s22 }
 0x135   : > { %s835_s22 = smov %s837_s26  ;;  %17 = sbr.rel (!%p15_p10) target bundleno = 4 (0x4), region = 92 }
 0x13a   :  { %404 = vsyncpa [#allocation4], 1 }
 0x13b   :  { %406 = vsyncpa [#allocation4 + $0x1], 1 }

</bundles_post_ra>
